<compile_context>
chip_gen: v6e
topology: v6e:2x2x1
jax: 0.10.0
libtpu: 0.0.40
codegen_flags: <defaults>
</compile_context>

<pallas_src>
import functools

import jax
import jax.numpy as jnp
from jax import lax
from jax.experimental import pallas as pl
from jax.experimental.pallas import tpu as pltpu

N_BITS = 8
N_LEVELS = 2 ** N_BITS          # 256
QMAX = float(N_LEVELS - 1)      # 255.0


def _round_up(a, b):
    return (a + b - 1) // b * b


def _calibrate(t):
    # BaseQuantizer.calibration
    scale = (jnp.max(t) - jnp.min(t)) / float(N_LEVELS)
    zero_point = jnp.min(t)
    return scale, zero_point


# --------------------------------------------------------------------------
# Pass 1: quantize the (K, N)-transposed weight to bf16 integer codes.
# --------------------------------------------------------------------------
def _make_weight_codes_kernel(k_true, tile_k, mask_k):
    def kernel(scal_ref, w_ref, o_ref):
        ws = scal_ref[2]
        wz = scal_ref[3]
        w = w_ref[...].astype(jnp.float32)
        codes = jnp.clip(jnp.round(w / ws + wz), 0.0, QMAX)
        if mask_k:
            # Zero codes in padded-K rows so they drop out of the deferred
            # zero-point correction in the matmul kernel.
            row = (pl.program_id(0) * tile_k
                   + lax.broadcasted_iota(jnp.int32, codes.shape, 0))
            codes = jnp.where(row < k_true, codes, 0.0)
        o_ref[...] = codes.astype(jnp.bfloat16)   # ints 0..255 exact in bf16
    return kernel


# --------------------------------------------------------------------------
# Pass 2: tiled matmul on integer codes with deferred scale/zero-point.
# --------------------------------------------------------------------------
def _make_matmul_kernel(k_true, tile_k, mask_k):
    def kernel(scal_ref, x_ref, wq_ref, b_ref, o_ref, acc_ref, sx_ref, sw_ref):
        k_idx = pl.program_id(2)

        @pl.when(k_idx == 0)
        def _init():
            acc_ref[...] = jnp.zeros_like(acc_ref)
            sx_ref[...] = jnp.zeros_like(sx_ref)
            sw_ref[...] = jnp.zeros_like(sw_ref)

        xs = scal_ref[0]
        xz = scal_ref[1]

        # Activation fake-quant -> integer codes (f32 elementwise math; only
        # the codes are cast to bf16 at the MXU boundary — v5e friendly).
        x = x_ref[...].astype(jnp.float32)
        x_int = jnp.clip(jnp.round(x / xs + xz), 0.0, QMAX)
        if mask_k:
            col = (k_idx * tile_k
                   + lax.broadcasted_iota(jnp.int32, x_int.shape, 1))
            x_int = jnp.where(col < k_true, x_int, 0.0)

        wq = wq_ref[...]                                   # bf16 codes (tk, tn)

        acc_ref[...] += jnp.dot(x_int.astype(jnp.bfloat16), wq,
                                preferred_element_type=jnp.float32)
        sx_ref[...] += jnp.sum(x_int, axis=1, keepdims=True)                # (tm,1)
        sw_ref[...] += jnp.sum(wq.astype(jnp.float32), axis=0, keepdims=True)  # (1,tn)

        @pl.when(k_idx == pl.num_programs(2) - 1)
        def _finalize():
            ws = scal_ref[2]
            wz = scal_ref[3]
            corr = (acc_ref[...]
                    - xz * sw_ref[...]
                    - wz * sx_ref[...]
                    + float(k_true) * xz * wz)
            o_ref[...] = (xs * ws) * corr + b_ref[...]     # bias added once
    return kernel


@functools.partial(jax.jit, static_argnames=("tm", "tn", "tk"))
def quant_linear(x, weight, bias, *, tm=256, tn=256, tk=512):
    """Fake-quantized linear. x: (..., K), weight: (N, K), bias: (N,)."""
    lead = x.shape[:-1]
    K = x.shape[-1]
    N = weight.shape[0]
    x2 = x.reshape(-1, K)
    M = x2.shape[0]

    # --- calibration (tiny global reductions; done on unpadded data) ---
    xs, xz = _calibrate(x2.astype(jnp.float32))
    ws, wz = _calibrate(weight.astype(jnp.float32))
    scalars = jnp.stack([xs, xz, ws, wz]).astype(jnp.float32)

    # --- tile sizes clipped to the (padded) problem size ---
    tm_e = min(tm, _round_up(M, 8))
    tn_e = min(tn, _round_up(N, 128))
    tk_e = min(tk, _round_up(K, 128))
    Mp = _round_up(M, tm_e)
    Np = _round_up(N, tn_e)
    Kp = _round_up(K, tk_e)
    mask_k = Kp != K

    x_p = jnp.pad(x2, ((0, Mp - M), (0, Kp - K)))
    # One-time relayout: (N, K) -> (K, N), lane-dense along N for the MXU.
    wt_p = jnp.pad(jnp.swapaxes(weight, 0, 1), ((0, Kp - K), (0, Np - N)))
    b_p = jnp.pad(bias.astype(jnp.float32).reshape(1, N), ((0, 0), (0, Np - N)))

    vmem_limit = 32 * 1024 * 1024

    # --- pass 1: weight -> bf16 integer codes (done once, not per M tile) ---
    wq = pl.pallas_call(
        _make_weight_codes_kernel(K, tk_e, mask_k),
        out_shape=jax.ShapeDtypeStruct((Kp, Np), jnp.bfloat16),
        grid=(Kp // tk_e, Np // tn_e),
        in_specs=[
            pl.BlockSpec(memory_space=pltpu.MemorySpace.SMEM),     # scalars
            pl.BlockSpec((tk_e, tn_e), lambda i, j: (i, j)),       # weight.T
        ],
        out_specs=pl.BlockSpec((tk_e, tn_e), lambda i, j: (i, j)),
        compiler_params=pltpu.CompilerParams(
            dimension_semantics=("parallel", "parallel"),
            vmem_limit_bytes=vmem_limit),
    )(scalars, wt_p)

    # --- pass 2: tiled matmul with f32 accumulator and deferred correction ---
    out_p = pl.pallas_call(
        _make_matmul_kernel(K, tk_e, mask_k),
        out_shape=jax.ShapeDtypeStruct((Mp, Np), jnp.float32),
        grid=(Mp // tm_e, Np // tn_e, Kp // tk_e),
        in_specs=[
            pl.BlockSpec(memory_space=pltpu.MemorySpace.SMEM),            # scalars
            pl.BlockSpec((tm_e, tk_e), lambda i, j, k: (i, k)),           # x
            pl.BlockSpec((tk_e, tn_e), lambda i, j, k: (k, j)),           # w codes
            pl.BlockSpec((1, tn_e), lambda i, j, k: (0, j)),              # bias
        ],
        out_specs=pl.BlockSpec((tm_e, tn_e), lambda i, j, k: (i, j)),
        scratch_shapes=[
            pltpu.VMEM((tm_e, tn_e), jnp.float32),   # acc  = sum_k x_int*w_int
            pltpu.VMEM((tm_e, 1), jnp.float32),      # sx   = sum_k x_int
            pltpu.VMEM((1, tn_e), jnp.float32),      # sw   = sum_k w_int
        ],
        compiler_params=pltpu.CompilerParams(
            dimension_semantics=("parallel", "parallel", "arbitrary"),
            vmem_limit_bytes=vmem_limit),
    )(scalars, x_p, wq, b_p)

    return out_p[:M, :N].reshape(*lead, N)


# --------------------------------------------------------------------------
# Pure-JAX reference (faithful f32 dequant matmul).
# --------------------------------------------------------------------------
def _reference(x, weight, bias):
    xs, xz = _calibrate(x)
    ws, wz = _calibrate(weight)
    x_dq = (jnp.clip(jnp.round(x / xs + xz), 0.0, QMAX) - xz) * xs
    w_dq = (jnp.clip(jnp.round(weight / ws + wz), 0.0, QMAX) - wz) * ws
    return jnp.einsum("...k,nk->...n", x_dq, w_dq,
                      precision=jax.lax.Precision.HIGHEST) + bias


if __name__ == "__main__":
    key = jax.random.PRNGKey(0)
    k_x, k_w, k_b = jax.random.split(key, 3)

    # Small shapes consistent with nn.Linear(in_features, out_features).
    batch, seq, in_features, out_features = 2, 8, 32, 16
    weight = jax.random.normal(k_w, (out_features, in_features), jnp.float32) * 0.1
    bias = jax.random.normal(k_b, (out_features,), jnp.float32) * 0.1
    x = jax.random.normal(k_x, (batch, seq, in_features), jnp.float32)

    out = quant_linear(x, weight, bias)
    out = jax.block_until_ready(out)
    ref = _reference(x, weight, bias)
    assert out.shape == (batch, seq, out_features)
    err = jnp.max(jnp.abs(out - ref))
    assert jnp.allclose(out, ref, atol=1e-4, rtol=1e-4), f"mismatch: {err}"

    # Second (still small) shape that exercises a real multi-tile grid:
    # M-grid=2, N-grid=2, K-grid=2, with K and N padding.
    k_x2, k_w2, k_b2 = jax.random.split(jax.random.PRNGKey(1), 3)
    b2, s2, k2, n2 = 2, 160, 600, 300
    w2 = jax.random.normal(k_w2, (n2, k2), jnp.float32) * 0.1
    bb2 = jax.random.normal(k_b2, (n2,), jnp.float32) * 0.1
    x2_in = jax.random.normal(k_x2, (b2, s2, k2), jnp.float32)

    out2 = jax.block_until_ready(quant_linear(x2_in, w2, bb2))
    ref2 = _reference(x2_in, w2, bb2)
    assert out2.shape == (b2, s2, n2)
    err2 = jnp.max(jnp.abs(out2 - ref2))
    assert jnp.allclose(out2, ref2, atol=1e-4, rtol=1e-4), f"mismatch: {err2}"

    print("KERNEL_OK")
</pallas_src>

<mosaic_0001>
module attributes {stable_mosaic.version = 11 : i64} {
  func.func @kernel(%arg0: i32, %arg1: i32, %arg2: i32, %arg3: memref<4xf32, #tpu.memory_space<smem>>, %arg4: memref<16x128xf32, #tpu.memory_space<vmem>>, %arg5: memref<128x128xbf16, #tpu.memory_space<vmem>>, %arg6: memref<1x128xf32, #tpu.memory_space<vmem>>, %arg7: memref<16x128xf32, #tpu.memory_space<vmem>>, %arg8: memref<16x128xf32, #tpu.memory_space<vmem>>, %arg9: memref<16x1xf32, #tpu.memory_space<vmem>>, %arg10: memref<1x128xf32, #tpu.memory_space<vmem>>) attributes {dimension_semantics = [#tpu.dimension_semantics<parallel>, #tpu.dimension_semantics<parallel>, #tpu.dimension_semantics<arbitrary>], iteration_bounds = array<i64: 1, 1, 1>, scalar_prefetch = 0 : i64, scratch_operands = 3 : i64, tpu.core_type = #tpu.core_type<tc>, window_params = [{transform_indices = @transform_0, window_bounds = array<i64: 4>}, {transform_indices = @transform_1, window_bounds = array<i64: 16, 128>}, {transform_indices = @transform_2, window_bounds = array<i64: 128, 128>}, {transform_indices = @transform_3, window_bounds = array<i64: 1, 128>}, {transform_indices = @transform_4, window_bounds = array<i64: 16, 128>}]} {
    %c0_i32 = arith.constant 0 : i32
    %0 = arith.cmpi eq, %arg2, %c0_i32 : i32
    %1 = arith.extui %0 : i1 to i32
    %c0_i32_0 = arith.constant 0 : i32
    %2 = arith.cmpi ne, %1, %c0_i32_0 : i32
    scf.if %2 {
      %cst_24 = arith.constant 0.000000e+00 : f32
      %43 = vector.broadcast %cst_24 : f32 to vector<16x128xf32>
      %c0_25 = arith.constant 0 : index
      %c0_26 = arith.constant 0 : index
      %44 = vector.load %arg8[%c0_25, %c0_26] : memref<16x128xf32, #tpu.memory_space<vmem>>, vector<16x128xf32>
      tpu.vector_store %arg8[%c0_25, %c0_26], %43 {strides = array<i32>} : memref<16x128xf32, #tpu.memory_space<vmem>>, vector<16x128xf32>,
      %cst_27 = arith.constant 0.000000e+00 : f32
      %45 = vector.broadcast %cst_27 : f32 to vector<16x1xf32>
      %c0_28 = arith.constant 0 : index
      %c0_29 = arith.constant 0 : index
      %46 = vector.load %arg9[%c0_28, %c0_29] : memref<16x1xf32, #tpu.memory_space<vmem>>, vector<16x1xf32>
      tpu.vector_store %arg9[%c0_28, %c0_29], %45 {strides = array<i32>} : memref<16x1xf32, #tpu.memory_space<vmem>>, vector<16x1xf32>,
      %cst_30 = arith.constant 0.000000e+00 : f32
      %47 = vector.broadcast %cst_30 : f32 to vector<1x128xf32>
      %c0_31 = arith.constant 0 : index
      %c0_32 = arith.constant 0 : index
      %48 = vector.load %arg10[%c0_31, %c0_32] : memref<1x128xf32, #tpu.memory_space<vmem>>, vector<1x128xf32>
      tpu.vector_store %arg10[%c0_31, %c0_32], %47 {strides = array<i32>} : memref<1x128xf32, #tpu.memory_space<vmem>>, vector<1x128xf32>,
    } else {
    }
    %c0 = arith.constant 0 : index
    %3 = memref.load %arg3[%c0] : memref<4xf32, #tpu.memory_space<smem>>
    %c1 = arith.constant 1 : index
    %4 = memref.load %arg3[%c1] : memref<4xf32, #tpu.memory_space<smem>>
    %c0_1 = arith.constant 0 : index
    %c0_2 = arith.constant 0 : index
    %5 = vector.load %arg4[%c0_1, %c0_2] : memref<16x128xf32, #tpu.memory_space<vmem>>, vector<16x128xf32>
    %6 = vector.broadcast %3 : f32 to vector<16x128xf32>
    %7 = arith.divf %5, %6 : vector<16x128xf32>
    %8 = vector.broadcast %4 : f32 to vector<16x128xf32>
    %9 = arith.addf %7, %8 : vector<16x128xf32>
    %10 = math.roundeven %9 : vector<16x128xf32>
    %cst = arith.constant 0.000000e+00 : f32
    %cst_3 = arith.constant 2.550000e+02 : f32
    %11 = vector.broadcast %cst : f32 to vector<16x128xf32>
    %12 = arith.maximumf %11, %10 : vector<16x128xf32>
    %13 = vector.broadcast %cst_3 : f32 to vector<16x128xf32>
    %14 = arith.minimumf %13, %12 : vector<16x128xf32>
    %c128_i32 = arith.constant 128 : i32
    %15 = arith.muli %arg2, %c128_i32 : i32
    %16 = tpu.iota {dimensions = array<i32: 1>} : vector<16x128xi32>
    %17 = vector.broadcast %15 : i32 to vector<16x128xi32>
    %18 = arith.addi %17, %16 : vector<16x128xi32>
    %c32_i32 = arith.constant 32 : i32
    %19 = vector.broadcast %c32_i32 : i32 to vector<16x128xi32>
    %20 = arith.cmpi slt, %18, %19 : vector<16x128xi32>
    %cst_4 = arith.constant 0.000000e+00 : f32
    %21 = vector.broadcast %cst_4 : f32 to vector<16x128xf32>
    %22 = arith.select %20, %14, %21 : vector<16x128xi1>, vector<16x128xf32>
    %c0_5 = arith.constant 0 : index
    %c0_6 = arith.constant 0 : index
    %23 = vector.load %arg5[%c0_5, %c0_6] : memref<128x128xbf16, #tpu.memory_space<vmem>>, vector<128x128xbf16>
    %c0_7 = arith.constant 0 : index
    %c0_8 = arith.constant 0 : index
    %24 = vector.load %arg8[%c0_7, %c0_8] : memref<16x128xf32, #tpu.memory_space<vmem>>, vector<16x128xf32>
    %25 = arith.truncf %22 : vector<16x128xf32> to vector<16x128xbf16>
    %cst_9 = arith.constant dense<0.000000e+00> : vector<16x128xf32>
    %26 = tpu.matmul %25, %23, %cst_9 {dimension_numbers = #tpu.dot_dimension_numbers<[1], [0], [0], [1], [0, 0, 1, 1], [], []>} : vector<16x128xbf16>, vector<128x128xbf16>, vector<16x128xf32> -> vector<16x128xf32>
    %27 = arith.addf %24, %26 : vector<16x128xf32>
    %c0_10 = arith.constant 0 : index
    %c0_11 = arith.constant 0 : index
    %28 = vector.load %arg8[%c0_10, %c0_11] : memref<16x128xf32, #tpu.memory_space<vmem>>, vector<16x128xf32>
    tpu.vector_store %arg8[%c0_10, %c0_11], %27 {strides = array<i32>} : memref<16x128xf32, #tpu.memory_space<vmem>>, vector<16x128xf32>,
    %c0_12 = arith.constant 0 : index
    %c0_13 = arith.constant 0 : index
    %29 = vector.load %arg9[%c0_12, %c0_13] : memref<16x1xf32, #tpu.memory_space<vmem>>, vector<16x1xf32>
    %cst_14 = arith.constant dense<0.000000e+00> : vector<16xf32>
    %30 = vector.multi_reduction <add>, %22, %cst_14 [1] : vector<16x128xf32> to vector<16xf32>
    %31 = vector.shape_cast %30 : vector<16xf32> to vector<16x1xf32>
    %32 = arith.addf %29, %31 : vector<16x1xf32>
    %c0_15 = arith.constant 0 : index
    %c0_16 = arith.constant 0 : index
    %33 = vector.load %arg9[%c0_15, %c0_16] : memref<16x1xf32, #tpu.memory_space<vmem>>, vector<16x1xf32>
    tpu.vector_store %arg9[%c0_15, %c0_16], %32 {strides = array<i32>} : memref<16x1xf32, #tpu.memory_space<vmem>>, vector<16x1xf32>,
    %c0_17 = arith.constant 0 : index
    %c0_18 = arith.constant 0 : index
    %34 = vector.load %arg10[%c0_17, %c0_18] : memref<1x128xf32, #tpu.memory_space<vmem>>, vector<1x128xf32>
    %35 = arith.extf %23 : vector<128x128xbf16> to vector<128x128xf32>
    %cst_19 = arith.constant dense<0.000000e+00> : vector<128xf32>
    %36 = vector.multi_reduction <add>, %35, %cst_19 [0] : vector<128x128xf32> to vector<128xf32>
    %37 = vector.shape_cast %36 : vector<128xf32> to vector<1x128xf32>
    %38 = arith.addf %34, %37 : vector<1x128xf32>
    %c0_20 = arith.constant 0 : index
    %c0_21 = arith.constant 0 : index
    %39 = vector.load %arg10[%c0_20, %c0_21] : memref<1x128xf32, #tpu.memory_space<vmem>>, vector<1x128xf32>
    tpu.vector_store %arg10[%c0_20, %c0_21], %38 {strides = array<i32>} : memref<1x128xf32, #tpu.memory_space<vmem>>, vector<1x128xf32>,
    %c0_i32_22 = arith.constant 0 : i32
    %40 = arith.cmpi eq, %arg2, %c0_i32_22 : i32
    %41 = arith.extui %40 : i1 to i32
    %c0_i32_23 = arith.constant 0 : i32
    %42 = arith.cmpi ne, %41, %c0_i32_23 : i32
    scf.if %42 {
      %c2 = arith.constant 2 : index
      %43 = memref.load %arg3[%c2] : memref<4xf32, #tpu.memory_space<smem>>
      %c3 = arith.constant 3 : index
      %44 = memref.load %arg3[%c3] : memref<4xf32, #tpu.memory_space<smem>>
      %c0_24 = arith.constant 0 : index
      %c0_25 = arith.constant 0 : index
      %45 = vector.load %arg8[%c0_24, %c0_25] : memref<16x128xf32, #tpu.memory_space<vmem>>, vector<16x128xf32>
      %c0_26 = arith.constant 0 : index
      %c0_27 = arith.constant 0 : index
      %46 = vector.load %arg10[%c0_26, %c0_27] : memref<1x128xf32, #tpu.memory_space<vmem>>, vector<1x128xf32>
      %47 = vector.broadcast %4 : f32 to vector<1x128xf32>
      %48 = arith.mulf %47, %46 : vector<1x128xf32>
      %49 = vector.broadcast %48 : vector<1x128xf32> to vector<16x128xf32>
      %50 = arith.subf %45, %49 : vector<16x128xf32>
      %c0_28 = arith.constant 0 : index
      %c0_29 = arith.constant 0 : index
      %51 = vector.load %arg9[%c0_28, %c0_29] : memref<16x1xf32, #tpu.memory_space<vmem>>, vector<16x1xf32>
      %52 = vector.broadcast %44 : f32 to vector<16x1xf32>
      %53 = arith.mulf %52, %51 : vector<16x1xf32>
      %54 = vector.broadcast %53 : vector<16x1xf32> to vector<16x128xf32>
      %55 = arith.subf %50, %54 : vector<16x128xf32>
      %cst_30 = arith.constant 3.200000e+01 : f32
      %56 = arith.mulf %cst_30, %4 : f32
      %57 = arith.mulf %56, %44 : f32
      %58 = vector.broadcast %57 : f32 to vector<16x128xf32>
      %59 = arith.addf %55, %58 : vector<16x128xf32>
      %60 = arith.mulf %3, %43 : f32
      %61 = vector.broadcast %60 : f32 to vector<16x128xf32>
      %62 = arith.mulf %61, %59 : vector<16x128xf32>
      %c0_31 = arith.constant 0 : index
      %c0_32 = arith.constant 0 : index
      %63 = vector.load %arg6[%c0_31, %c0_32] : memref<1x128xf32, #tpu.memory_space<vmem>>, vector<1x128xf32>
      %64 = vector.broadcast %63 : vector<1x128xf32> to vector<16x128xf32>
      %65 = arith.addf %62, %64 : vector<16x128xf32>
      %c0_33 = arith.constant 0 : index
      %c0_34 = arith.constant 0 : index
      %66 = vector.load %arg7[%c0_33, %c0_34] : memref<16x128xf32, #tpu.memory_space<vmem>>, vector<16x128xf32>
      tpu.vector_store %arg7[%c0_33, %c0_34], %65 {strides = array<i32>} : memref<16x128xf32, #tpu.memory_space<vmem>>, vector<16x128xf32>,
    } else {
    }
    return
  }
  func.func @transform_0(%arg0: i32, %arg1: i32, %arg2: i32) -> i32 {
    %c0_i32 = arith.constant 0 : i32
    %c0_i32_0 = arith.constant 0 : i32
    return %c0_i32 : i32
  }
  func.func @transform_1(%arg0: i32, %arg1: i32, %arg2: i32) -> (i32, i32) {
    %c0_i32 = arith.constant 0 : i32
    return %arg0, %arg2 : i32, i32
  }
  func.func @transform_2(%arg0: i32, %arg1: i32, %arg2: i32) -> (i32, i32) {
    %c0_i32 = arith.constant 0 : i32
    return %arg2, %arg1 : i32, i32
  }
  func.func @transform_3(%arg0: i32, %arg1: i32, %arg2: i32) -> (i32, i32) {
    %c0_i32 = arith.constant 0 : i32
    %c0_i32_0 = arith.constant 0 : i32
    return %c0_i32, %arg1 : i32, i32
  }
  func.func @transform_4(%arg0: i32, %arg1: i32, %arg2: i32) -> (i32, i32) {
    %c0_i32 = arith.constant 0 : i32
    return %arg0, %arg1 : i32, i32
  }
}

module attributes {stable_mosaic.version = 11 : i64} {
  func.func @kernel(%arg0: i32, %arg1: i32, %arg2: memref<4xf32, #tpu.memory_space<smem>>, %arg3: memref<128x128xf32, #tpu.memory_space<vmem>>, %arg4: memref<128x128xbf16, #tpu.memory_space<vmem>>) attributes {dimension_semantics = [#tpu.dimension_semantics<parallel>, #tpu.dimension_semantics<parallel>], iteration_bounds = array<i64: 1, 1>, scalar_prefetch = 0 : i64, scratch_operands = 0 : i64, tpu.core_type = #tpu.core_type<tc>, window_params = [{transform_indices = @transform_0, window_bounds = array<i64: 4>}, {transform_indices = @transform_1, window_bounds = array<i64: 128, 128>}, {transform_indices = @transform_2, window_bounds = array<i64: 128, 128>}]} {
    %c2 = arith.constant 2 : index
    %0 = memref.load %arg2[%c2] : memref<4xf32, #tpu.memory_space<smem>>
    %c3 = arith.constant 3 : index
    %1 = memref.load %arg2[%c3] : memref<4xf32, #tpu.memory_space<smem>>
    %c0 = arith.constant 0 : index
    %c0_0 = arith.constant 0 : index
    %2 = vector.load %arg3[%c0, %c0_0] : memref<128x128xf32, #tpu.memory_space<vmem>>, vector<128x128xf32>
    %3 = vector.broadcast %0 : f32 to vector<128x128xf32>
    %4 = arith.divf %2, %3 : vector<128x128xf32>
    %5 = vector.broadcast %1 : f32 to vector<128x128xf32>
    %6 = arith.addf %4, %5 : vector<128x128xf32>
    %7 = math.roundeven %6 : vector<128x128xf32>
    %cst = arith.constant 0.000000e+00 : f32
    %cst_1 = arith.constant 2.550000e+02 : f32
    %8 = vector.broadcast %cst : f32 to vector<128x128xf32>
    %9 = arith.maximumf %8, %7 : vector<128x128xf32>
    %10 = vector.broadcast %cst_1 : f32 to vector<128x128xf32>
    %11 = arith.minimumf %10, %9 : vector<128x128xf32>
    %c128_i32 = arith.constant 128 : i32
    %12 = arith.muli %arg0, %c128_i32 : i32
    %13 = tpu.iota {dimensions = array<i32: 0>} : vector<128x128xi32>
    %14 = vector.broadcast %12 : i32 to vector<128x128xi32>
    %15 = arith.addi %14, %13 : vector<128x128xi32>
    %c32_i32 = arith.constant 32 : i32
    %16 = vector.broadcast %c32_i32 : i32 to vector<128x128xi32>
    %17 = arith.cmpi slt, %15, %16 : vector<128x128xi32>
    %cst_2 = arith.constant 0.000000e+00 : f32
    %18 = vector.broadcast %cst_2 : f32 to vector<128x128xf32>
    %19 = arith.select %17, %11, %18 : vector<128x128xi1>, vector<128x128xf32>
    %20 = arith.truncf %19 : vector<128x128xf32> to vector<128x128xbf16>
    %c0_3 = arith.constant 0 : index
    %c0_4 = arith.constant 0 : index
    %21 = vector.load %arg4[%c0_3, %c0_4] : memref<128x128xbf16, #tpu.memory_space<vmem>>, vector<128x128xbf16>
    tpu.vector_store %arg4[%c0_3, %c0_4], %20 {strides = array<i32>} : memref<128x128xbf16, #tpu.memory_space<vmem>>, vector<128x128xbf16>,
    return
  }
  func.func @transform_0(%arg0: i32, %arg1: i32) -> i32 {
    %c0_i32 = arith.constant 0 : i32
    %c0_i32_0 = arith.constant 0 : i32
    return %c0_i32 : i32
  }
  func.func @transform_1(%arg0: i32, %arg1: i32) -> (i32, i32) {
    %c0_i32 = arith.constant 0 : i32
    return %arg0, %arg1 : i32, i32
  }
  func.func @transform_2(%arg0: i32, %arg1: i32) -> (i32, i32) {
    %c0_i32 = arith.constant 0 : i32
    return %arg0, %arg1 : i32, i32
  }
}

</mosaic_0001>

<bundles_post_ra>
// kernel: quant_linear.3
= control target key start
LH: loop header
LB: loop body
LE: loop exit
PB: predicated region body
PF: predicated region fallthrough
CT: control target
= control target key end

     0   :  { %9 = vsyncpa [#allocation6], 0  ;;  %s508_s0 = inlined_call_operand.vmem [shape: f32[4], index: 0, kind: input, shape index: {}]   ;;  %s509_s1 = inlined_call_operand.vmem [shape: f32[16,128], index: 1, kind: input, shape index: {}]   ;;  %s510_s2 = inlined_call_operand.vmem [shape: bf16[128,128], index: 2, kind: input, shape index: {}]   ;;  %s511_s3 = inlined_call_operand.vmem [shape: f32[1,128], index: 3, kind: input, shape index: {}]   ;;  %s512_s4 = inlined_call_operand.vmem [shape: f32[16,128], index: 4, kind: output, shape index: {}]  }
   0x1   :  { %s16_s17 = sshll.u32 %s508_s0, 4  ;;  %s17_s17 = int_to_ptr.vmem [resolvable:$true] %s16_s17 }
   0x2   :  { %s372_s18 = scalar_lea.vmem %s17_s17, 16  ;;  %p377_p1 = scmp.lt.s32.totalorder %s17_s17, %s17_s17 }
   0x3   :  { %p373_p0 = scmp.ne.s32.totalorder %s17_s17, %s372_s18  ;;  %p378_p2 = scmp.lt.s32.totalorder %s372_s18, %s372_s18 }
   0x5   :  { %p379_p3 = por %p378_p2, %p377_p1 }
   0x7   :  { %p380_p4 = pnand %p379_p3, %p373_p0 }
   0x9   :  { %383 = shalt.err (!%p380_p4)
}
   0xa   :  { %s386_s19 = smov [#allocation5]  }
   0xb   :  { %19 = dma.vmem_to_smem %s17_s17, 16, %s386_s19, [#allocation6]  }
   0xc   :  { %384 = dma.done.wait [#allocation6], 16  }
   0xd   :  { %385 = vsyncadd [#allocation6], 4294967280 }
   0xe   :  { %29 = sfence }
   0xf   :  { %s418_s20 = sld [smem:[#allocation5]]  ;;  %v423_v0 = vld [vmem:[%s510_s2 + $0x38] sm:$0xff]   ;;  %v387_v1 = vmov 0.0   ;;  %v430_v2 = vld [vmem:[%s510_s2 + $0x30] sm:$0xff]   ;;  %vm388_vm0 = vmmov 0   ;;  %v438_v3 = vld [vmem:[%s510_s2 + $0x28] sm:$0xff]   ;;  %v59_v38 = vlaneseq }
  0x10   :  { %312 = vmatprep.subr.bf16.mxu0 %v387_v1  ;;  %40 = vst [vmem:[#allocation4] sm:$0x1] %v387_v1  ;;  %328 = vmatprep.mubr.msk.bf16.mxu0 %vm388_vm0, %v387_v1  ;;  %v68_v5 = vld [vmem:[%s510_s2 + $0x8] sm:$0xff]   ;;  %v448_v6 = vld [vmem:[%s510_s2] sm:$0xff]   ;;  %v70_v13 = vld [vmem:[%s510_s2 + $0x10] sm:$0xff]   ;;  %s460_s8 = sld [smem:[#allocation5 + $0x1]]  ;;  %v200_v35 = vunpack.c.l.bf16 %v438_v3  ;;  %v201_v41 = vunpack.c.h.bf16 %v438_v3  ;;  %v202_v48 = vunpack.c.l.bf16 %v430_v2  ;;  %v203_v52 = vunpack.c.h.bf16 %v430_v2 }
  0x11   :  { %313 = vmatpush3.bf16.msra.mxu0 %v423_v0  ;;  %v74_v7 = vld [vmem:[%s510_s2 + $0x20] sm:$0xff]   ;;  %v192_v8 = vunpack.c.l.bf16 %v68_v5  ;;  %v190_v9 = vunpack.c.l.bf16 %v448_v6  ;;  %v191_v10 = vunpack.c.h.bf16 %v448_v6  ;;  %v193_v11 = vunpack.c.h.bf16 %v68_v5  ;;  %v72_v14 = vld [vmem:[%s510_s2 + $0x18] sm:$0xff]   ;;  %v44_v22 = vld [vmem:[%s509_s1 + $0x8] sm:$0xff]  ;;  %s300_s2 = sld [smem:[#allocation5 + $0x2]] }
  0x12   :  { %314 = vmatprep.subr.bf16.mxu0 %v387_v1  ;;  %v194_v15 = vunpack.c.l.bf16 %v70_v13  ;;  %v195_v17 = vunpack.c.h.bf16 %v70_v13  ;;  %v196_v19 = vunpack.c.l.bf16 %v72_v14  ;;  %v43_v21 = vld [vmem:[%s509_s1] sm:$0xff]  ;;  %v197_v23 = vunpack.c.h.bf16 %v72_v14  ;;  %s301_s1 = sld [smem:[#allocation5 + $0x3]] }
  0x13   :  { %v206_v12 = vadd.f32 %v191_v10, %v190_v9  ;;  %v198_v27 = vunpack.c.l.bf16 %v74_v7  ;;  %v199_v31 = vunpack.c.h.bf16 %v74_v7  ;;  %v60_v55 = vand.u32 127, %v59_v38 }
  0x14   :  { %v204_v57 = vunpack.c.l.bf16 %v423_v0  ;;  %v205_v62 = vunpack.c.h.bf16 %v423_v0  ;;  %vm37_vm5 = vcmask 7168   ;;  %v389_v0 = vmov 0  }
  0x15   :  { %v45_v4 = vstv %s418_s20  ;;  %315 = vmatpush3.bf16.msra.mxu0 %v430_v2  ;;  %v207_v16 = vadd.f32 %v206_v12, %v192_v8  ;;  %vm63_vm3 = vcmp.lt.s32.totalorder %v60_v55, 32  ;;  %38 = vst.msk [vmem:[#allocation3] sm:$0xff] %vm37_vm5, %v387_v1  ;;  %39 = vst.msk [vmem:[#allocation3 + $0x8] sm:$0xff] %vm37_vm5, %v387_v1  ;;  %352 = vset.pattern.permute.xlu1 %v389_v0 }
  0x16   :  { %370 = vrcp.f32 %v45_v4  ;;  %316 = vmatprep.subr.bf16.mxu0 %v387_v1  ;;  %v474_v26 = vstv %s460_s8  ;;  %vm297_vm4 = vmpackc.low %vm63_vm3, %vm63_vm3  ;;  %353 = vset.pattern.permute.xlu0 %v389_v0  ;;  %s263_s15 = smul.f32 32.0, %s460_s8 }
  0x17   :  { %v208_v18 = vadd.f32 %v207_v16, %v193_v11  ;;  %v189_v16 = vld [vmem:[#allocation4] sm:$0x1]  ;;  %s268_s17 = smul.f32 %s300_s2, %s418_s20 }
  0x18   :  { %s264_s16 = smul.f32 %s301_s1, %s263_s15 }
  0x19   :  { %317 = vmatpush3.bf16.msra.mxu0 %v438_v3  ;;  %v209_v20 = vadd.f32 %v208_v18, %v194_v15 }
  0x1a   :  { %318 = vmatprep.subr.bf16.mxu0 %v387_v1 }
  0x1b   :  { %v210_v24 = vadd.f32 %v209_v20, %v195_v17 }
  0x1c   :  { %v178_v18 = vld [vmem:[#allocation3] sm:$0xff] }
  0x1d   :  { %319 = vmatpush3.bf16.msra.mxu0 %v74_v7  ;;  %v211_v28 = vadd.f32 %v210_v24, %v196_v19 }
  0x1e   :  { %320 = vmatprep.subr.bf16.mxu0 %v387_v1 }
  0x1f   :  { %v212_v32 = vadd.f32 %v211_v28, %v197_v23  ;;  %v248_v23 = vstv %s301_s1 }
  0x21   :  { %321 = vmatpush3.bf16.msra.mxu0 %v72_v14  ;;  %v213_v36 = vadd.f32 %v212_v32, %v198_v27 }
  0x22   :  { %322 = vmatprep.subr.bf16.mxu0 %v387_v1 }
  0x23   :  { %v371_v25 = vpop.eup %370  ;;  %v214_v42 = vadd.f32 %v213_v36, %v199_v31 }
  0x24   :  { %v47_v29 = vmul.f32 %v371_v25, %v43_v21  ;;  %v48_v30 = vmul.f32 %v371_v25, %v44_v22  ;;  %v179_v21 = vld [vmem:[#allocation3 + $0x8] sm:$0xff] }
  0x25   :  { %323 = vmatpush3.bf16.msra.mxu0 %v70_v13  ;;  %v215_v49 = vadd.f32 %v214_v42, %v200_v35 }
  0x26   :  { %v50_v33 = vadd.f32 %v474_v26, %v47_v29  ;;  %v51_v34 = vadd.f32 %v474_v26, %v48_v30  ;;  %324 = vmatprep.subr.bf16.mxu0 %v387_v1 }
  0x27   :  { %v216_v53 = vadd.f32 %v215_v49, %v201_v41 }
  0x28   :  { %v334_v37 = vcvt.f32.s32 %v50_v33  ;;  %v332_v39 = vand.u32 2147483647, %v50_v33  ;;  %v342_v40 = vcvt.f32.s32 %v51_v34  ;;  %v337_v44 = vand.u32 2147483648, %v50_v33 }
  0x29   :  { %v340_v45 = vand.u32 2147483647, %v51_v34  ;;  %325 = vmatpush3.bf16.msra.mxu0 %v68_v5  ;;  %v345_v47 = vand.u32 2147483648, %v51_v34  ;;  %v217_v58 = vadd.f32 %v216_v53, %v202_v48 }
  0x2a   :  { %v335_v43 = vcvt.s32.f32 %v334_v37  ;;  %v343_v46 = vcvt.s32.f32 %v342_v40  ;;  %326 = vmatprep.subr.bf16.mxu0 %v387_v1  ;;  %vm333_vm1 = vcmp.lt.f32.partialorder %v332_v39, 8388608.0  ;;  %v265_v40 = vstv %s264_s16 }
  0x2b   :  { %vm341_vm2 = vcmp.lt.f32.partialorder %v340_v45, 8388608.0  ;;  %v218_v63 = vadd.f32 %v217_v58, %v203_v52 }
  0x2c   :  { %v336_v50 = vand.u32 2147483647, %v335_v43  ;;  %v344_v51 = vand.u32 2147483647, %v343_v46  ;;  %v269_v43 = vstv %s268_s17 }
  0x2d   :  { %327 = vmatpush3.bf16.msra.mxu0 %v448_v6  ;;  %v219_v4 = vadd.f32 %v218_v63, %v204_v57 }
  0x2e   :  { %v338_v54 = vor.u32 %v337_v44, %v336_v50  ;;  %v346_v56 = vor.u32 %v345_v47, %v344_v51 }
  0x2f   :  { %v220_v8 = vadd.f32 %v219_v4, %v205_v62 }
  0x30   :  { %v339_v59 = vsel %vm333_vm1, %v338_v54, %v50_v33  ;;  %v347_v61 = vsel %vm341_vm2, %v346_v56, %v51_v34  ;;  %v240_v33 = vshrl.u32 %v59_v38, 7  ;;  %v302_v38 = vld [vmem:[%s511_s3] ss:$0 sm:$0xff] }
  0x31   :  { %v54_v60 = vmax.f32 %v339_v59, 0.0  ;;  %v55_v3 = vmax.f32 %v347_v61, 0.0  ;;  %v221_v10 = vrot.slane %v220_v8, 4 }
  0x32   :  { %v241_v36 = vsub.s32 0, %v240_v33 }
  0x33   :  { %v56_v2 = vmin.f32 %v54_v60, 255.0  ;;  %v57_v5 = vmin.f32 %v55_v3, 255.0  ;;  %v222_v11 = vadd.f32 %v221_v10, %v220_v8 }
  0x35   :  { %v64_v7 = vsel %vm63_vm3, %v56_v2, 0.0  ;;  %v298_v6 = vpack.c.bf16 %v57_v5, %v56_v2  ;;  %v65_v9 = vsel %vm63_vm3, %v57_v5, 0.0  ;;  %v223_v12 = vrot.slane %v222_v11, 2 }
  0x36   :  { %180 = vadd.xlane.f32.xlu0 %v64_v7 }
  0x37   :  { %329 = vmatmul.mubr.msk.bf16.vlgmr.msra.gmra.mxu0 %vm297_vm4, %v298_v6  ;;  %v224_v13 = vadd.f32 %v223_v12, %v222_v11 }
  0x39   :  { %v225_v14 = vrot.slane %v224_v13, 1 }
  0x3a   :  { %182 = vadd.xlane.f32.xlu0 %v65_v9 }
  0x3b   :  { %v226_v15 = vadd.f32 %v225_v14, %v224_v13 }
  0x3d   :  { %v227_v17 = vadd.f32 %v226_v15, %v189_v16 }
  0x3f   :  { %228 = vst [vmem:[#allocation4] sm:$0x1] %v227_v17 }
  0x46   :  { %v236_v34 = vld [vmem:[#allocation4] sm:$0x1] }
  0x47   :  { %v237_v35 = vmul.f32 %v236_v34, %v474_v26 }
  0x49   :  { %v242_v37 = vrot.slane %v237_v35, %v241_v36 }
  0xbf   :  { %v181_v19 = vpop.xlane.xlu0 %180 }
  0xc0   :  { %v184_v20 = vadd.f32 %v181_v19, %v178_v18 }
  0xc2   :  { %187 = vst.msk [vmem:[#allocation3] sm:$0xff] %vm37_vm5, %v184_v20 }
  0xc3   :  { %v183_v1 = vpop.xlane.xlu0 %182 }
  0xc4   :  { %v185_v22 = vadd.f32 %v183_v1, %v179_v21 }
  0xc6   :  { %188 = vst.msk [vmem:[#allocation3 + $0x8] sm:$0xff] %vm37_vm5, %v185_v22 }
  0xc9   :  { %v246_v24 = vld [vmem:[#allocation3] sm:$0xff] }
  0xca   :  { %v249_v25 = vmul.f32 %v248_v23, %v246_v24 }
  0xcc   :  { %253 = vperm.xlu1 %352, %v249_v25  }
  0xcd   :  { %v247_v27 = vld [vmem:[#allocation3 + $0x8] sm:$0xff] }
  0xce   :  { %v250_v28 = vmul.f32 %v248_v23, %v247_v27 }
  0xd0   :  { %258 = vperm.xlu1 %352, %v250_v28  }
  0xf7   :  { %v167_v29 = vpop.f32.mrf.mxu0 }
  0xf8   :  { %v244_v39 = vsub.f32 %v167_v29, %v242_v37 }
  0xf9   :  { %v330_v30 = vpop.f32.mrf.mxu0 }
  0xfb   :  { %v170_v31 = vpop.f32.mrf.mxu0 }
  0xfc   :  { %v245_v44 = vsub.f32 %v170_v31, %v242_v37 }
  0xfd   :  { %v331_v32 = vpop.f32.mrf.mxu0 }
 0x147   :  { %v254_v41 = vpop.permute.xlu1 %253 }
 0x148   :  { %v261_v42 = vsub.f32 %v244_v39, %v254_v41 }
 0x14a   :  { %v266_v45 = vadd.f32 %v265_v40, %v261_v42 }
 0x14b   :  { %v259_v46 = vpop.permute.xlu1 %258 }
 0x14c   :  { %v270_v47 = vmul.f32 %v269_v43, %v266_v45  ;;  %v262_v26 = vsub.f32 %v245_v44, %v259_v46 }
 0x14e   :  { %v279_v48 = vadd.f32 %v302_v38, %v270_v47  ;;  %v267_v49 = vadd.f32 %v265_v40, %v262_v26 }
 0x150   :  { %281 = vst [vmem:[%s512_s4] sm:$0xff] %v279_v48  ;;  %v271_v50 = vmul.f32 %v269_v43, %v267_v49 }
 0x152   :  { %v280_v51 = vadd.f32 %v302_v38, %v271_v50 }
 0x154   :  { %282 = vst [vmem:[%s512_s4 + $0x8] sm:$0xff] %v280_v51 }
 0x155   :  { %287 = vsyncpa [#allocation6], 1 }

// kernel: quant_linear.2
= control target key start
LH: loop header
LB: loop body
LE: loop exit
PB: predicated region body
PF: predicated region fallthrough
CT: control target
= control target key end

     0   :  { %7 = vsyncpa [#allocation3], 0  ;;  %s446_s0 = inlined_call_operand.vmem [shape: f32[4], index: 0, kind: input, shape index: {}]   ;;  %s447_s1 = inlined_call_operand.vmem [shape: f32[128,128], index: 1, kind: input, shape index: {}]   ;;  %s448_s2 = inlined_call_operand.vmem [shape: bf16[128,128], index: 2, kind: output, shape index: {}]  }
   0x1   :  { %s14_s11 = sshll.u32 %s446_s0, 4  ;;  %s15_s11 = int_to_ptr.vmem [resolvable:$true] %s14_s11 }
   0x2   :  { %s346_s12 = scalar_lea.vmem %s15_s11, 16  ;;  %p351_p1 = scmp.lt.s32.totalorder %s15_s11, %s15_s11 }
   0x3   :  { %p347_p0 = scmp.ne.s32.totalorder %s15_s11, %s346_s12  ;;  %p352_p2 = scmp.lt.s32.totalorder %s346_s12, %s346_s12 }
   0x5   :  { %p353_p3 = por %p352_p2, %p351_p1 }
   0x7   :  { %p354_p4 = pnand %p353_p3, %p347_p0 }
   0x9   :  { %357 = shalt.err (!%p354_p4)
}
   0xa   :  { %s360_s13 = smov [#allocation2]  }
   0xb   :  { %17 = dma.vmem_to_smem %s15_s11, 16, %s360_s13, [#allocation3]  }
   0xc   :  { %358 = dma.done.wait [#allocation3], 16  }
   0xd   :  { %359 = vsyncadd [#allocation3], 4294967280 }
   0xe   :  { %23 = sfence }
   0xf   :  { %s277_s14 = sld [smem:[#allocation2 + $0x2]]  ;;  %v361_v0 = vmov 0.0|0.0   ;;  %v26_v4 = vld [vmem:[%s447_s1] sm:$0xff]  ;;  %v27_v5 = vld [vmem:[%s447_s1 + $0x8] sm:$0xff]  ;;  %v28_v6 = vld [vmem:[%s447_s1 + $0x10] sm:$0xff] }
  0x10   :  { %v283_v1 = vcombine.low %v361_v0, %v361_v0  ;;  %v284_v2 = vcombine.high %v361_v0, %v361_v0  ;;  %s278_s10 = sld [smem:[#allocation2 + $0x3]]  ;;  %v29_v7 = vld [vmem:[%s447_s1 + $0x18] sm:$0xff] }
  0x12   :  { %260 = vst [vmem:[%s448_s2 + $0x10] sm:$0xf] %v283_v1  ;;  %262 = vst [vmem:[%s448_s2 + $0x18] sm:$0xf] %v283_v1 }
  0x13   :  { %264 = vst [vmem:[%s448_s2 + $0x20] sm:$0xf] %v283_v1  ;;  %266 = vst [vmem:[%s448_s2 + $0x28] sm:$0xf] %v283_v1 }
  0x14   :  { %268 = vst [vmem:[%s448_s2 + $0x30] sm:$0xf] %v283_v1  ;;  %270 = vst [vmem:[%s448_s2 + $0x38] sm:$0xf] %v283_v1 }
  0x15   :  { %261 = vst [vmem:[%s448_s2 + $0x14] sm:$0xf] %v284_v2  ;;  %263 = vst [vmem:[%s448_s2 + $0x1c] sm:$0xf] %v284_v2  ;;  %v42_v3 = vstv %s277_s14 }
  0x16   :  { %265 = vst [vmem:[%s448_s2 + $0x24] sm:$0xf] %v284_v2  ;;  %267 = vst [vmem:[%s448_s2 + $0x2c] sm:$0xf] %v284_v2  ;;  %344 = vrcp.f32 %v42_v3  ;;  %v60_v9 = vstv %s278_s10 }
  0x17   :  { %269 = vst [vmem:[%s448_s2 + $0x34] sm:$0xf] %v284_v2  ;;  %271 = vst [vmem:[%s448_s2 + $0x3c] sm:$0xf] %v284_v2 }
  0x23   :  { %v345_v8 = vpop.eup %344 }
  0x24   :  { %v44_v10 = vmul.f32 %v345_v8, %v26_v4  ;;  %v45_v11 = vmul.f32 %v345_v8, %v27_v5  ;;  %v46_v12 = vmul.f32 %v345_v8, %v28_v6  ;;  %v47_v13 = vmul.f32 %v345_v8, %v29_v7 }
  0x26   :  { %v61_v14 = vadd.f32 %v60_v9, %v44_v10  ;;  %v62_v15 = vadd.f32 %v60_v9, %v45_v11  ;;  %v63_v16 = vadd.f32 %v60_v9, %v46_v12  ;;  %v64_v20 = vadd.f32 %v60_v9, %v47_v13 }
  0x28   :  { %v310_v17 = vand.u32 2147483647, %v61_v14  ;;  %v312_v18 = vcvt.f32.s32 %v61_v14  ;;  %v318_v19 = vand.u32 2147483647, %v62_v15  ;;  %v320_v21 = vcvt.f32.s32 %v62_v15 }
  0x29   :  { %v328_v22 = vcvt.f32.s32 %v63_v16  ;;  %v315_v24 = vand.u32 2147483648, %v61_v14  ;;  %v326_v25 = vand.u32 2147483647, %v63_v16  ;;  %v323_v27 = vand.u32 2147483648, %v62_v15 }
  0x2a   :  { %v313_v23 = vcvt.s32.f32 %v312_v18  ;;  %v321_v26 = vcvt.s32.f32 %v320_v21  ;;  %v331_v29 = vand.u32 2147483648, %v63_v16  ;;  %vm428_vm0 = vcmp.lt.f32.partialorder %v310_v17, 8388608.0 }
  0x2b   :  { %v329_v28 = vcvt.s32.f32 %v328_v22  ;;  %vm432_vm1 = vcmp.lt.f32.partialorder %v318_v19, 8388608.0  ;;  %v336_v33 = vcvt.f32.s32 %v64_v20  ;;  %v334_v36 = vand.u32 2147483647, %v64_v20 }
  0x2c   :  { %v314_v31 = vand.u32 2147483647, %v313_v23  ;;  %v322_v34 = vand.u32 2147483647, %v321_v26  ;;  %vm327_vm2 = vcmp.lt.f32.partialorder %v326_v25, 8388608.0  ;;  %v339_v39 = vand.u32 2147483648, %v64_v20 }
  0x2d   :  { %v330_v35 = vand.u32 2147483647, %v329_v28  ;;  %v337_v38 = vcvt.s32.f32 %v336_v33  ;;  %vm335_vm3 = vcmp.lt.f32.partialorder %v334_v36, 8388608.0 }
  0x2e   :  { %v316_v37 = vor.u32 %v315_v24, %v314_v31  ;;  %v324_v40 = vor.u32 %v323_v27, %v322_v34 }
  0x2f   :  { %v332_v41 = vor.u32 %v331_v29, %v330_v35  ;;  %v338_v43 = vand.u32 2147483647, %v337_v38 }
  0x30   :  { %v317_v42 = vsel %vm428_vm0, %v316_v37, %v61_v14  ;;  %v325_v44 = vsel %vm432_vm1, %v324_v40, %v62_v15 }
  0x31   :  { %v93_v45 = vmax.f32 %v317_v42, 0.0  ;;  %v333_v46 = vsel %vm327_vm2, %v332_v41, %v63_v16  ;;  %v94_v47 = vmax.f32 %v325_v44, 0.0  ;;  %v340_v48 = vor.u32 %v339_v39, %v338_v43 }
  0x32   :  { %v95_v49 = vmax.f32 %v333_v46, 0.0 }
  0x33   :  { %v109_v50 = vmin.f32 %v93_v45, 255.0  ;;  %v110_v51 = vmin.f32 %v94_v47, 255.0  ;;  %v341_v52 = vsel %vm335_vm3, %v340_v48, %v64_v20 }
  0x34   :  { %v96_v53 = vmax.f32 %v341_v52, 0.0  ;;  %v111_v54 = vmin.f32 %v95_v49, 255.0 }
  0x35   :  { %v302_v55 = vpack.c.bf16 %v110_v51, %v109_v50 }
  0x36   :  { %v112_v56 = vmin.f32 %v96_v53, 255.0 }
  0x37   :  { %303 = vst [vmem:[%s448_s2] sm:$0xff] %v302_v55  }
  0x38   :  { %v307_v57 = vpack.c.bf16 %v112_v56, %v111_v54 }
  0x3a   :  { %309 = vst [vmem:[%s448_s2 + $0x8] sm:$0xff] %v307_v57  }
  0x3b   :  { %276 = vsyncpa [#allocation3], 1 }

</bundles_post_ra>
